<compile_context>
chip_gen: v7x
topology: tpu7x:2x2x1
jax: 0.10.0
libtpu: 0.0.40
codegen_flags: <defaults>
</compile_context>

<pallas_src>
import math

import jax
import jax.numpy as jnp
import numpy as np
from jax import lax
from jax.experimental import pallas as pl
from jax.experimental.pallas import tpu as pltpu


def _round_up(x, m):
    return ((x + m - 1) // m) * m


# ----------------------------------------------------------------------------
# Pass 1: fused K/V projection of social_ht, done once.
# ----------------------------------------------------------------------------
def _kv_proj_kernel(soc_ref, wkv_ref, bkv_ref, k_ref, v_ref):
    H = k_ref.shape[1]
    kv = jnp.dot(soc_ref[...], wkv_ref[...],
                 preferred_element_type=jnp.float32) + bkv_ref[...]
    kv = jnp.maximum(kv, 0.0)
    k_ref[...] = kv[:, :H].astype(k_ref.dtype)
    v_ref[...] = kv[:, H:].astype(v_ref.dtype)


# ----------------------------------------------------------------------------
# Pass 2: flash-style windowed attention with online softmax.
# ----------------------------------------------------------------------------
def _attn_kernel(kv_blk_start_ref, kv_blk_cnt_ref,       # scalar prefetch (SMEM)
                 start_ref, end_ref, enc_ref, wq_ref, bq_ref, k_ref, v_ref,
                 out_ref,
                 q_scr, m_scr, l_scr, acc_scr):
    i = pl.program_id(0)            # batch tile
    j = pl.program_id(1)            # kv step within this batch tile's window
    n_kv = pl.num_programs(1)
    tk = k_ref.shape[0]

    @pl.when(j == 0)
    def _init():
        # Q projection once per batch tile; wq pre-transposed and pre-scaled
        # by 1/sqrt(H) in the wrapper.
        q = jnp.dot(enc_ref[...].astype(wq_ref.dtype), wq_ref[...],
                    preferred_element_type=jnp.float32) + bq_ref[...]
        q_scr[...] = jnp.maximum(q, 0.0).astype(q_scr.dtype)
        m_scr[...] = jnp.full_like(m_scr, -jnp.inf)
        l_scr[...] = jnp.zeros_like(l_scr)
        acc_scr[...] = jnp.zeros_like(acc_scr)

    # Steps past this batch tile's contiguous window are skipped: the KV
    # index_map clamps to the last in-window block (no new DMA) and this
    # pl.when drops the compute.
    @pl.when(j < kv_blk_cnt_ref[i])
    def _step():
        k = k_ref[...]
        v = v_ref[...]
        # NT contraction (last dim of q against last dim of k): no activation
        # transpose is materialized; the MXU consumes k directly.
        s = lax.dot_general(q_scr[...], k, (((1,), (1,)), ((), ())),
                            preferred_element_type=jnp.float32)     # (Bt, tk)

        # Per-row [start, end) window mask — single unsigned compare.
        # start/end stay as a tiny (Bt, 1) VMEM block because the mask needs
        # them as vectors; the per-tile scalars live in SMEM (prefetch).
        blk = kv_blk_start_ref[i] + j
        col = blk * tk + lax.broadcasted_iota(jnp.int32, s.shape, 1)
        start = start_ref[...]
        width = (end_ref[...] - start).astype(jnp.uint32)
        in_win = (col - start).astype(jnp.uint32) < width
        s = jnp.where(in_win, s, -jnp.inf)

        # Online-softmax update; guarded so fully-masked rows stay NaN-free.
        m_prev = m_scr[...]
        m_new = jnp.maximum(m_prev, jnp.max(s, axis=-1, keepdims=True))
        m_safe = jnp.where(m_new == -jnp.inf, 0.0, m_new)
        p = jnp.exp(s - m_safe)                        # masked cols -> 0
        alpha = jnp.exp(m_prev - m_safe)               # m_prev == -inf -> 0
        l_scr[...] = alpha * l_scr[...] + jnp.sum(p, axis=-1, keepdims=True)
        acc_scr[...] = alpha * acc_scr[...] + jnp.dot(
            p.astype(v.dtype), v, preferred_element_type=jnp.float32)
        m_scr[...] = m_new

    @pl.when(j == n_kv - 1)
    def _finalize():
        # Normalize AFTER the p@v matmul: one multiply over (Bt, H), not (Bt, N).
        l = l_scr[...]
        denom = jnp.where(l > 0.0, l, 1.0)             # empty window -> zero row
        r = pl.reciprocal(denom, approx=True)          # EUP vrcp
        r = r * (2.0 - denom * r)                      # one Newton step -> f32
        out_ref[...] = (acc_scr[...] * r).astype(out_ref.dtype)


# ----------------------------------------------------------------------------
# Wrapper
# ----------------------------------------------------------------------------
def _pick_batch_tile(B):
    """Multiple of 8, <=128; gives >=2 grid steps when B allows (v7x 2 TCs)."""
    if B >= 256:
        return 128
    if B > 8:
        return min(128, _round_up(pl.cdiv(B, 2), 8))
    return _round_up(max(B, 1), 8)


def _pick_kv_tile(N, compute_dtype):
    sub = 8 if jnp.dtype(compute_dtype).itemsize == 4 else 16
    if N >= 128:
        return 128
    return _round_up(max(N, 1), sub)


def social_attention(enc_hidden, social_ht, neighbors_idx_start,
                     neighbors_idx_end, params, *,
                     compute_dtype=jnp.bfloat16, b_tile=None, kv_tile=None):
    """SGNet SocialAttention forward.

    enc_hidden: (B, H) f32; social_ht: (N, H) f32;
    neighbors_idx_*: (B,) int — contiguous [start, end) window per sample;
    params: PyTorch-layout (out_features, in_features) Linear params.
    compute_dtype: dtype fed to the MXU (bf16 = native rate on v5e/v6e/v7x);
    accumulation and softmax math stay f32.
    """
    out_dtype = enc_hidden.dtype
    B, H = enc_hidden.shape
    N = social_ht.shape[0]
    wq, bq, wk, bk, wv, bv = params
    compute_dtype = jnp.dtype(compute_dtype)

    # --- parameter prep (trace-time, free) ---------------------------------
    inv_sqrt_d = 1.0 / math.sqrt(float(H))
    wq_t = (wq.T * inv_sqrt_d).astype(compute_dtype)                  # (H, H)
    bq2 = (bq * inv_sqrt_d).reshape(1, H).astype(jnp.float32)
    wkv_t = jnp.concatenate([wk.T, wv.T], axis=1).astype(compute_dtype)  # (H, 2H)
    bkv2 = jnp.concatenate([bk, bv]).reshape(1, 2 * H).astype(jnp.float32)

    # --- tiling & padding ---------------------------------------------------
    if b_tile is None:
        b_tile = _pick_batch_tile(B)
    if kv_tile is None:
        kv_tile = _pick_kv_tile(N, compute_dtype)
    B_pad = _round_up(B, b_tile)
    N_pad = _round_up(N, kv_tile)
    n_b = B_pad // b_tile
    n_kv_blocks = N_pad // kv_tile

    enc_p = jnp.pad(enc_hidden, ((0, B_pad - B), (0, 0)))              # stays f32
    soc_p = jnp.pad(social_ht, ((0, N_pad - N), (0, 0))).astype(compute_dtype)

    starts = jnp.pad(jnp.asarray(neighbors_idx_start, jnp.int32), (0, B_pad - B))
    ends = jnp.pad(jnp.asarray(neighbors_idx_end, jnp.int32), (0, B_pad - B))
    start2 = starts.reshape(B_pad, 1)
    end2 = ends.reshape(B_pad, 1)

    # Per-batch-tile contiguous neighbor window -> first KV block + #blocks.
    tile_lo = jnp.min(starts.reshape(n_b, b_tile), axis=1)
    tile_hi = jnp.max(ends.reshape(n_b, b_tile), axis=1)
    kv_blk_start = jnp.clip(tile_lo // kv_tile, 0, n_kv_blocks - 1).astype(jnp.int32)
    kv_blk_cnt = jnp.clip((tile_hi + kv_tile - 1) // kv_tile - kv_blk_start,
                          1, n_kv_blocks - kv_blk_start).astype(jnp.int32)

    # Static kv-grid extent: shrink to the widest per-tile window when the
    # indices are concrete (outside jit); otherwise fall back to all blocks
    # (extra steps are nearly free: clamped index_map => no DMA, pl.when
    # => no compute).
    n_kv_steps = n_kv_blocks
    try:
        n_kv_steps = max(1, int(np.max(np.asarray(jax.device_get(kv_blk_cnt)))))
    except Exception:
        pass

    # --- pass 1: project social_ht -> K, V once -----------------------------
    k_all, v_all = pl.pallas_call(
        _kv_proj_kernel,
        out_shape=(jax.ShapeDtypeStruct((N_pad, H), compute_dtype),
                   jax.ShapeDtypeStruct((N_pad, H), compute_dtype)),
        grid_spec=pltpu.PrefetchScalarGridSpec(
            num_scalar_prefetch=0,
            grid=(n_kv_blocks,),
            in_specs=[
                pl.BlockSpec((kv_tile, H), lambda i: (i, 0)),          # social_ht
                pl.BlockSpec((H, 2 * H), lambda i: (0, 0)),            # wkv (pre-T)
                pl.BlockSpec((1, 2 * H), lambda i: (0, 0)),            # bkv
            ],
            out_specs=(pl.BlockSpec((kv_tile, H), lambda i: (i, 0)),   # K
                       pl.BlockSpec((kv_tile, H), lambda i: (i, 0))),  # V
        ),
        compiler_params=pltpu.CompilerParams(
            dimension_semantics=("parallel",)),
        cost_estimate=pl.CostEstimate(
            flops=2 * N_pad * H * 2 * H,
            transcendentals=0,
            bytes_accessed=(N_pad * H * compute_dtype.itemsize * 3
                            + 2 * H * H * compute_dtype.itemsize)),
    )(soc_p, wkv_t, bkv2)

    # --- pass 2: flash attention over the per-sample windows ----------------
    def kv_index_map(i, j, bs_ref, bc_ref):
        # Clamp to the last in-window block: steps past the window reuse the
        # previous block index, so the pipeline issues no further DMAs.
        return bs_ref[i] + jnp.minimum(j, bc_ref[i] - 1), 0

    def batch_map(i, j, bs_ref, bc_ref):
        return i, 0

    def const_map(i, j, bs_ref, bc_ref):
        return 0, 0

    # Rough per-step VMEM working set (double-buffered inputs + output + scratch).
    est_bytes = (
        2 * (2 * b_tile * 4
             + b_tile * H * enc_p.dtype.itemsize
             + H * H * compute_dtype.itemsize + H * 4
             + 2 * kv_tile * H * compute_dtype.itemsize)
        + 2 * b_tile * H * 4
        + b_tile * H * (compute_dtype.itemsize + 4)
        + 2 * b_tile * 4)
    vmem_limit = None
    if est_bytes > 32 * 1024 * 1024:
        # Cap at v7x's 64 MiB physical VMEM per TensorCore.
        vmem_limit = int(min(64 * 1024 * 1024, est_bytes * 5 // 4))

    out_pad = pl.pallas_call(
        _attn_kernel,
        out_shape=jax.ShapeDtypeStruct((B_pad, H), out_dtype),
        grid_spec=pltpu.PrefetchScalarGridSpec(
            num_scalar_prefetch=2,                       # kv_blk_start, kv_blk_cnt
            grid=(n_b, n_kv_steps),
            in_specs=[
                pl.BlockSpec((b_tile, 1), batch_map),        # start (per row)
                pl.BlockSpec((b_tile, 1), batch_map),        # end   (per row)
                pl.BlockSpec((b_tile, H), batch_map),        # enc_hidden
                pl.BlockSpec((H, H), const_map),             # wq (pre-T, pre-scaled)
                pl.BlockSpec((1, H), const_map),             # bq
                pl.BlockSpec((kv_tile, H), kv_index_map),    # K tile
                pl.BlockSpec((kv_tile, H), kv_index_map),    # V tile
            ],
            out_specs=pl.BlockSpec((b_tile, H), batch_map),
            scratch_shapes=[
                pltpu.VMEM((b_tile, H), compute_dtype),      # q
                pltpu.VMEM((b_tile, 1), jnp.float32),        # m (running max)
                pltpu.VMEM((b_tile, 1), jnp.float32),        # l (running sum)
                pltpu.VMEM((b_tile, H), jnp.float32),        # acc
            ],
        ),
        compiler_params=pltpu.CompilerParams(
            dimension_semantics=("parallel", "arbitrary"),
            vmem_limit_bytes=vmem_limit),
        cost_estimate=pl.CostEstimate(
            flops=2 * B_pad * H * H + 4 * B_pad * n_kv_steps * kv_tile * H,
            transcendentals=B_pad * n_kv_steps * kv_tile + B_pad,
            bytes_accessed=(B_pad * H * (enc_p.dtype.itemsize + 4)
                            + 2 * n_b * n_kv_steps * kv_tile * H
                            * compute_dtype.itemsize
                            + H * H * compute_dtype.itemsize)),
    )(kv_blk_start, kv_blk_cnt, start2, end2, enc_p, wq_t, bq2, k_all, v_all)

    return out_pad[:B]


# ----------------------------------------------------------------------------
# Params / reference / demo
# ----------------------------------------------------------------------------
def init_params(key, hidden_dim):
    """Deterministic Linear params, PyTorch layout (out_features, in_features)."""
    ks = jax.random.split(key, 6)
    bound = 1.0 / math.sqrt(hidden_dim)

    def lin(kw, kb):
        w = jax.random.uniform(kw, (hidden_dim, hidden_dim), jnp.float32,
                               -bound, bound)
        b = jax.random.uniform(kb, (hidden_dim,), jnp.float32, -bound, bound)
        return w, b

    wq, bq = lin(ks[0], ks[1])
    wk, bk = lin(ks[2], ks[3])
    wv, bv = lin(ks[4], ks[5])
    return (wq, bq, wk, bk, wv, bv)


def _reference(enc_hidden, social_ht, starts, ends, params):
    """Pure-JAX reference mirroring the PyTorch per-sample loop."""
    wq, bq, wk, bk, wv, bv = params
    H = enc_hidden.shape[1]
    outs = []
    for i in range(enc_hidden.shape[0]):
        s0, e0 = int(starts[i]), int(ends[i])
        if e0 <= s0:                                   # empty window -> zero row
            outs.append(jnp.zeros((1, H), enc_hidden.dtype))
            continue
        eh = enc_hidden[i:i + 1]
        sh = social_ht[s0:e0]
        q = jnp.maximum(eh @ wq.T + bq, 0.0) / math.sqrt(H)
        k = jnp.maximum(sh @ wk.T + bk, 0.0)
        v = jnp.maximum(sh @ wv.T + bv, 0.0)
        p = jax.nn.softmax(q @ k.T, axis=-1)
        outs.append(p @ v)
    return jnp.concatenate(outs, axis=0)


if __name__ == "__main__":
    hidden_dim = 32
    B = 4            # number of target agents
    N = 16           # total rows in social_ht (all neighbors, flattened)

    key = jax.random.PRNGKey(0)
    k_enc, k_soc, k_par = jax.random.split(key, 3)

    enc_hidden = jax.random.normal(k_enc, (B, hidden_dim), jnp.float32)
    social_ht = jax.random.normal(k_soc, (N, hidden_dim), jnp.float32)
    params = init_params(k_par, hidden_dim)

    starts = jnp.array([0, 3, 8, 11], dtype=jnp.int32)
    ends = jnp.array([3, 8, 11, 16], dtype=jnp.int32)
    ref = _reference(enc_hidden, social_ht, starts, ends, params)

    # f32 MXU path: tight correctness check against the per-sample reference.
    out = social_attention(enc_hidden, social_ht, starts, ends, params,
                           compute_dtype=jnp.float32)
    out = jax.block_until_ready(out)
    assert out.shape == (B, hidden_dim)
    assert jnp.allclose(out, ref, rtol=1e-4, atol=1e-4), "f32 mismatch"

    # bf16 MXU path (production default per review): looser check.
    out_bf = social_attention(enc_hidden, social_ht, starts, ends, params,
                              compute_dtype=jnp.bfloat16)
    out_bf = jax.block_until_ready(out_bf)
    assert jnp.allclose(out_bf, ref, rtol=1e-1, atol=1e-1), "bf16 mismatch"

    # Empty neighbor window -> zero row (PyTorch would softmax an empty slice).
    starts_e = jnp.array([0, 3, 3, 10], dtype=jnp.int32)
    ends_e = jnp.array([3, 3, 10, 16], dtype=jnp.int32)
    out_e = jax.block_until_ready(
        social_attention(enc_hidden, social_ht, starts_e, ends_e, params,
                         compute_dtype=jnp.float32))
    ref_e = _reference(enc_hidden, social_ht, starts_e, ends_e, params)
    assert jnp.allclose(out_e, ref_e, rtol=1e-4, atol=1e-4), "empty-window mismatch"

    print("KERNEL_OK")
</pallas_src>

<mosaic_0001>
module attributes {stable_mosaic.version = 11 : i64} {
  func.func @_kv_proj_kernel(%arg0: i32, %arg1: memref<16x32xf32, #tpu.memory_space<vmem>>, %arg2: memref<32x64xf32, #tpu.memory_space<vmem>>, %arg3: memref<1x64xf32, #tpu.memory_space<vmem>>, %arg4: memref<16x32xf32, #tpu.memory_space<vmem>>, %arg5: memref<16x32xf32, #tpu.memory_space<vmem>>) attributes {dimension_semantics = [#tpu.dimension_semantics<parallel>], iteration_bounds = array<i64: 1>, scalar_prefetch = 0 : i64, scratch_operands = 0 : i64, tpu.core_type = #tpu.core_type<tc>, window_params = [{transform_indices = @transform_0, window_bounds = array<i64: 16, 32>}, {pipeline_mode = #tpu.pipeline_mode<synchronous>, transform_indices = @transform_1, window_bounds = array<i64: 32, 64>}, {pipeline_mode = #tpu.pipeline_mode<synchronous>, transform_indices = @transform_2, window_bounds = array<i64: 1, 64>}, {transform_indices = @transform_3, window_bounds = array<i64: 16, 32>}, {transform_indices = @transform_4, window_bounds = array<i64: 16, 32>}]} {
    %c0 = arith.constant 0 : index
    %c0_0 = arith.constant 0 : index
    %0 = vector.load %arg1[%c0, %c0_0] : memref<16x32xf32, #tpu.memory_space<vmem>>, vector<16x32xf32>
    %c0_1 = arith.constant 0 : index
    %c0_2 = arith.constant 0 : index
    %1 = vector.load %arg2[%c0_1, %c0_2] : memref<32x64xf32, #tpu.memory_space<vmem>>, vector<32x64xf32>
    %cst = arith.constant dense<0.000000e+00> : vector<16x64xf32>
    %2 = tpu.matmul %0, %1, %cst {dimension_numbers = #tpu.dot_dimension_numbers<[1], [0], [0], [1], [0, 0, 1, 1], [], []>} : vector<16x32xf32>, vector<32x64xf32>, vector<16x64xf32> -> vector<16x64xf32>
    %c0_3 = arith.constant 0 : index
    %c0_4 = arith.constant 0 : index
    %3 = vector.load %arg3[%c0_3, %c0_4] : memref<1x64xf32, #tpu.memory_space<vmem>>, vector<1x64xf32>
    %4 = vector.broadcast %3 : vector<1x64xf32> to vector<16x64xf32>
    %5 = arith.addf %2, %4 : vector<16x64xf32>
    %cst_5 = arith.constant 0.000000e+00 : f32
    %6 = vector.broadcast %cst_5 : f32 to vector<16x64xf32>
    %7 = arith.maximumf %5, %6 : vector<16x64xf32>
    %8 = vector.extract_strided_slice %7 {offsets = [0, 0], sizes = [16, 32], strides = [1, 1]} : vector<16x64xf32> to vector<16x32xf32>
    %c0_6 = arith.constant 0 : index
    %c0_7 = arith.constant 0 : index
    %9 = vector.load %arg4[%c0_6, %c0_7] : memref<16x32xf32, #tpu.memory_space<vmem>>, vector<16x32xf32>
    tpu.vector_store %arg4[%c0_6, %c0_7], %8 {strides = array<i32>} : memref<16x32xf32, #tpu.memory_space<vmem>>, vector<16x32xf32>,
    %10 = vector.extract_strided_slice %7 {offsets = [0, 32], sizes = [16, 32], strides = [1, 1]} : vector<16x64xf32> to vector<16x32xf32>
    %c0_8 = arith.constant 0 : index
    %c0_9 = arith.constant 0 : index
    %11 = vector.load %arg5[%c0_8, %c0_9] : memref<16x32xf32, #tpu.memory_space<vmem>>, vector<16x32xf32>
    tpu.vector_store %arg5[%c0_8, %c0_9], %10 {strides = array<i32>} : memref<16x32xf32, #tpu.memory_space<vmem>>, vector<16x32xf32>,
    return
  }
  func.func @transform_0(%arg0: i32) -> (i32, i32) {
    %c0_i32 = arith.constant 0 : i32
    %c0_i32_0 = arith.constant 0 : i32
    return %arg0, %c0_i32 : i32, i32
  }
  func.func @transform_1(%arg0: i32) -> (i32, i32) {
    %c0_i32 = arith.constant 0 : i32
    %c0_i32_0 = arith.constant 0 : i32
    %c0_i32_1 = arith.constant 0 : i32
    return %c0_i32, %c0_i32_0 : i32, i32
  }
  func.func @transform_2(%arg0: i32) -> (i32, i32) {
    %c0_i32 = arith.constant 0 : i32
    %c0_i32_0 = arith.constant 0 : i32
    %c0_i32_1 = arith.constant 0 : i32
    return %c0_i32, %c0_i32_0 : i32, i32
  }
  func.func @transform_3(%arg0: i32) -> (i32, i32) {
    %c0_i32 = arith.constant 0 : i32
    %c0_i32_0 = arith.constant 0 : i32
    return %arg0, %c0_i32 : i32, i32
  }
  func.func @transform_4(%arg0: i32) -> (i32, i32) {
    %c0_i32 = arith.constant 0 : i32
    %c0_i32_0 = arith.constant 0 : i32
    return %arg0, %c0_i32 : i32, i32
  }
}

</mosaic_0001>

<bundles_post_ra>
// kernel: tpu_custom_call.1
= control target key start
LH: loop header
LB: loop body
LE: loop exit
PB: predicated region body
PF: predicated region fallthrough
CT: control target
= control target key end

     0   :  { %10 = vsyncpa [#allocation3], 0  ;;  %s421_s0 = inlined_call_operand.hbm [shape: f32[16,32], index: 0, kind: input, shape index: {}]   ;;  %s422_s1 = inlined_call_operand.hbm [shape: f32[32,64], index: 1, kind: input, shape index: {}]   ;;  %s423_s2 = inlined_call_operand.vmem [shape: f32[1,64], index: 2, kind: input, shape index: {}]   ;;  %s424_s3 = inlined_call_operand.hbm [shape: f32[16,32], index: 3, kind: output, shape index: {0}]   ;;  %s425_s4 = inlined_call_operand.hbm [shape: f32[16,32], index: 4, kind: output, shape index: {1}]  }
   0x1   :  { %11 = vsyncpa [#allocation6], 0 }
   0x2   :  { %12 = vsyncpa [#allocation4], 0 }
   0x3   :  { %13 = vsyncpa [#allocation9], 0  ;;  %s320_s15 = smov [#allocation2]   ;;  %s224_s19 = scalar_lea.hbm %s421_s0, 256 }
   0x4   :  { %s19_s16 = sshll.u32 %s320_s15, 4  ;;  %p225_p0 = scmp.ne.s32.totalorder %s421_s0, %s224_s19  ;;  %s20_s16 = int_to_ptr.vmem [resolvable:$true] %s19_s16 }
   0x5   :  { %p228_p1 = scmp.lt.u32.totalorder %s224_s19, %s421_s0 }
   0x7   :  { %p230_p2 = pnand %p228_p1, %p225_p0 }
   0x9   :  { %233 = shalt.err (!%p230_p2)
}
   0xa   :  { %s234_s24 = scalar_lea.vmem %s20_s16, 256  ;;  %p239_p4 = scmp.lt.s32.totalorder %s20_s16, %s20_s16 }
   0xb   :  { %p235_p3 = scmp.ne.s32.totalorder %s20_s16, %s234_s24  ;;  %p240_p5 = scmp.lt.s32.totalorder %s234_s24, %s234_s24 }
   0xd   :  { %p241_p6 = por %p240_p5, %p239_p4 }
   0xf   :  { %p242_p7 = pnand %p241_p6, %p235_p3 }
  0x11   :  { %245 = shalt.err (!%p242_p7)
}
  0x12   :  { %s321_s25 = smov 128   ;;  %s322_s26 = smov 8  }
  0x13   :  { %25 = dma.hbm_to_vmem [thread:$0]  %s421_s0, 256, %s20_s16, [#allocation3], %s321_s25, %s321_s25, %s322_s26  }
  0x14   :  { %s323_s29 = smov [#allocation5]   ;;  %s246_s7 = scalar_lea.hbm %s422_s1, 512 }
  0x15   :  { %s31_s30 = sshll.u32 %s323_s29, 4  ;;  %p247_p8 = scmp.ne.s32.totalorder %s422_s1, %s246_s7  ;;  %s32_s30 = int_to_ptr.vmem [resolvable:$true] %s31_s30 }
  0x16   :  { %p250_p9 = scmp.lt.u32.totalorder %s246_s7, %s422_s1 }
  0x18   :  { %p252_p10 = pnand %p250_p9, %p247_p8 }
  0x1a   :  { %255 = shalt.err (!%p252_p10)
}
  0x1b   :  { %s256_s12 = scalar_lea.vmem %s32_s30, 512  ;;  %p261_p12 = scmp.lt.s32.totalorder %s32_s30, %s32_s30 }
  0x1c   :  { %p257_p11 = scmp.ne.s32.totalorder %s32_s30, %s256_s12  ;;  %p262_p13 = scmp.lt.s32.totalorder %s256_s12, %s256_s12 }
  0x1e   :  { %p263_p0 = por %p262_p13, %p261_p12 }
  0x20   :  { %p264_p1 = pnand %p263_p0, %p257_p11 }
  0x22   :  { %267 = shalt.err (!%p264_p1)
}
  0x23   :  { %37 = dma.hbm_to_vmem [thread:$0]  %s422_s1, 512, %s32_s30, [#allocation6], %s321_s25, %s321_s25, %s322_s26  }
  0x24   :  { %312 = dma.done.wait [#allocation3], 256  }
  0x25   :  { %313 = vsyncadd [#allocation3], 4294967040 }
  0x26   :  { %314 = dma.done.wait [#allocation6], 512  }
  0x27   :  { %315 = vsyncadd [#allocation6], 4294966784  ;;  %vm59_vm0 = vcmask 261120   ;;  %v48_v0 = vld [vmem:[#allocation5] sm:$0xff]  ;;  %v49_v1 = vld [vmem:[#allocation5 + $0x8] sm:$0xff]  ;;  %s324_s15 = smov [#allocation7]  }
  0x28   :  { %v50_v2 = vld [vmem:[#allocation5 + $0x10] sm:$0xff]  ;;  %v209_v3 = vpack.c.bf16 %v49_v1, %v48_v0  ;;  %v51_v4 = vld [vmem:[#allocation5 + $0x18] sm:$0xff]  ;;  %s160_s16 = sshll.u32 %s324_s15, 4  ;;  %s325_s17 = smov 96   ;;  %s161_s16 = int_to_ptr.vmem [resolvable:$true] %s160_s16 }
  0x29   :  { %v46_v5 = vld [vmem:[#allocation2] sm:$0xff]  ;;  %v213_v6 = vpack.c.bf16 %v51_v4, %v50_v2  ;;  %v47_v7 = vld [vmem:[#allocation2 + $0x8] sm:$0xff]  ;;  %s268_s18 = scalar_lea.vmem %s161_s16, 256  ;;  %p273_p3 = scmp.lt.s32.totalorder %s161_s16, %s161_s16 }
  0x2a   :  { %206 = vmatprep.mubr.msk.f32.mxu0 %vm59_vm0, %v46_v5  ;;  %210 = vmatprep.subr.bf16.mxu0 %v209_v3  ;;  %v189_v8 = vld [vmem:[%s423_s2] ss:$0 sm:$0xff]  ;;  %p269_p2 = scmp.ne.s32.totalorder %s161_s16, %s268_s18  ;;  %p274_p4 = scmp.lt.s32.totalorder %s268_s18, %s268_s18 }
  0x2b   :  { %212 = vmatpush3.bf16.msra.mxu0 %v209_v3 }
  0x2c   :  { %214 = vmatprep.subr.bf16.mxu0 %v213_v6  ;;  %p275_p5 = por %p274_p4, %p273_p3 }
  0x2e   :  { %p276_p6 = pnand %p275_p5, %p269_p2 }
  0x2f   :  { %216 = vmatpush3.bf16.msra.mxu0 %v213_v6 }
  0x32   :  { %207 = vmatmul.mubr.msk.f32.vlgmr.msra.gmra.mrb[0].mxu0 %vm59_vm0, %v47_v7 }
 0x105   :  { %v208_v9 = vpop.f32.mrb[0].mxu0 }
 0x106   :  { %v138_v10 = vadd.f32 %v208_v9, %v189_v8  ;;  %v132_v11 = vpop.f32.mrb[1].mxu0 }
 0x107   :  { %v133_v12 = vadd.f32 %v189_v8, %v132_v11 }
 0x108   :  { %v142_v13 = vmax.f32 %v138_v10, 0.0 }
 0x109   :  { %v141_v14 = vmax.f32 %v133_v12, 0.0 }
 0x10a   :  { %144 = vst.msk [vmem:[#allocation7 + $0x8] sm:$0xff] %vm59_vm0, %v142_v13 }
 0x10b   :  { %143 = vst.msk [vmem:[#allocation7] sm:$0xff] %vm59_vm0, %v141_v14  ;;  %147 = vrot.lane.b32.xlu0 %v141_v14, %s325_s17 }
 0x10c   :  { %279 = shalt.err (!%p276_p6)
}
 0x10d   :  { %s280_s20 = scalar_lea.hbm %s424_s3, 256 }
 0x10e   :  { %p281_p7 = scmp.ne.s32.totalorder %s424_s3, %s280_s20  ;;  %p284_p8 = scmp.lt.u32.totalorder %s280_s20, %s424_s3 }
 0x110   :  { %p286_p9 = pnand %p284_p8, %p281_p7 }
 0x112   :  { %289 = shalt.err (!%p286_p9)
}
 0x113   :  { %166 = dma.vmem_to_hbm [thread:$0]  %s161_s16, 256, %s424_s3, [#allocation4], %s321_s25, %s321_s25, %s322_s26  }
 0x114   :  { %149 = vrot.lane.b32.xlu0 %v142_v13, %s325_s17  ;;  %s326_s29 = smov [#allocation8]  }
 0x115   :  { %s172_s30 = sshll.u32 %s326_s29, 4  ;;  %s173_s30 = int_to_ptr.vmem [resolvable:$true] %s172_s30 }
 0x116   :  { %s290_s5 = scalar_lea.vmem %s173_s30, 256  ;;  %p295_p11 = scmp.lt.s32.totalorder %s173_s30, %s173_s30 }
 0x117   :  { %p291_p10 = scmp.ne.s32.totalorder %s173_s30, %s290_s5  ;;  %p296_p12 = scmp.lt.s32.totalorder %s290_s5, %s290_s5 }
 0x119   :  { %p297_p13 = por %p296_p12, %p295_p11 }
 0x11b   :  { %p298_p0 = pnand %p297_p13, %p291_p10 }
 0x17d   :  { %v148_v15 = vpop.permute.xlu0 %147 }
 0x17e   :  { %153 = vst.msk [vmem:[#allocation8] sm:$0xff] %vm59_vm0, %v148_v15 }
 0x186   :  { %v150_v16 = vpop.permute.xlu0 %149 }
 0x187   :  { %154 = vst.msk [vmem:[#allocation8 + $0x8] sm:$0xff] %vm59_vm0, %v150_v16 }
 0x188   :  { %301 = shalt.err (!%p298_p0)
}
 0x189   :  { %s302_s3 = scalar_lea.hbm %s425_s4, 256 }
 0x18a   :  { %p303_p1 = scmp.ne.s32.totalorder %s425_s4, %s302_s3  ;;  %p306_p2 = scmp.lt.u32.totalorder %s302_s3, %s425_s4 }
 0x18c   :  { %p308_p3 = pnand %p306_p2, %p303_p1 }
 0x18e   :  { %311 = shalt.err (!%p308_p3)
}
 0x18f   :  { %178 = dma.vmem_to_hbm [thread:$0]  %s173_s30, 256, %s425_s4, [#allocation9], %s321_s25, %s321_s25, %s322_s26  }
 0x190   :  { %316 = dma.done.wait [#allocation4], 256  }
 0x191   :  { %317 = vsyncadd [#allocation4], 4294967040 }
 0x192   :  { %318 = dma.done.wait [#allocation9], 256  }
 0x193   :  { %319 = vsyncadd [#allocation9], 4294967040 }
 0x194   :  { %185 = vsyncpa [#allocation3], 1 }
 0x195   :  { %186 = vsyncpa [#allocation6], 1 }
 0x196   :  { %187 = vsyncpa [#allocation4], 1 }
 0x197   :  { %188 = vsyncpa [#allocation9], 1 }

</bundles_post_ra>
